<compile_context>
chip_gen: v5e
topology: v5e:2x2
jax: 0.10.0
libtpu: 0.0.40
codegen_flags: <defaults>
</compile_context>

<pallas_src>
import jax
import jax.numpy as jnp
from jax import lax
from jax.experimental import pallas as pl
from jax.experimental.pallas import tpu as pltpu

NEG_SLOPE = 0.01   # torch.nn.LeakyReLU default negative_slope
HIDDEN = 32
LANE = 128         # lane-padding target (vreg lane width)


def _leaky(x):
    return jnp.where(x >= 0, x, NEG_SLOPE * x)


# ---------------------------------------------------------------------------
# The single fused kernel: conv1 + conv2 + edge-label gather + dot
# ---------------------------------------------------------------------------
def _build_fused_kernel(n_types, mt_src, mt_dst, score_idx, n_layers=2):
    """Kernel closed over the (static) heterogeneous graph structure.

    Flat ref order:
      [x per node type] [A per message type] [w_stack] [b_stack] [s_stack] [out]
    """
    n_mt = len(mt_src)
    n_dst = n_types  # every node type is a destination (asserted host-side)

    def kernel(*refs):
        x_refs = refs[:n_types]
        a_refs = refs[n_types:n_types + n_mt]
        w_ref = refs[n_types + n_mt]
        b_ref = refs[n_types + n_mt + 1]
        s_ref = refs[n_types + n_mt + 2]
        o_ref = refs[n_types + n_mt + 3]

        # adjacencies loaded once, reused by both conv layers
        a_vals = [r[...] for r in a_refs]
        x_cur = [r[...] for r in x_refs]          # f32, lane-padded to 128

        for layer in range(n_layers):
            w_off = layer * (n_mt + n_dst)
            b_off = layer * n_dst
            # TODO(synk): dropout is identity here (eval-mode semantics); training
            # dropout would use pltpu.prng_seed / pltpu.prng_random_bits.
            # LeakyReLU stays f32 on the VPU; bf16 only for MXU operands (v5e has
            # no bf16 VPU, so elementwise work must not move to bf16).
            act = [_leaky(x).astype(jnp.bfloat16) for x in x_cur]

            # neighbor path: accumulate A_mt @ (act_src @ Wc_n_mt) per dst type
            # (no in-kernel concatenate; plain f32 value accumulation).
            agg = [None] * n_dst
            for m in range(n_mt):
                h = jnp.dot(act[mt_src[m]], w_ref[w_off + m],
                            preferred_element_type=jnp.float32)
                c = jnp.dot(a_vals[m], h.astype(jnp.bfloat16),
                            preferred_element_type=jnp.float32)
                d = mt_dst[m]
                agg[d] = c if agg[d] is None else agg[d] + c

            # self path + (summed) bias per dst node type, f32 epilogue on the VPU
            x_cur = [agg[d]
                     + jnp.dot(act[d], w_ref[w_off + n_mt + d],
                               preferred_element_type=jnp.float32)
                     + b_ref[b_off + d]
                     for d in range(n_dst)]

        # link-prediction scores: gathers expressed as one-hot selection matmuls
        # (bf16 selection matrices are exact), lane-dense (1, E_pad) output row.
        xn1 = x_cur[score_idx].astype(jnp.bfloat16)
        dn = (((0,), (0,)), ((), ()))                       # contract the node axis
        g0 = lax.dot_general(xn1, s_ref[0], dn, preferred_element_type=jnp.float32)
        g1 = lax.dot_general(xn1, s_ref[1], dn, preferred_element_type=jnp.float32)
        # only the first HIDDEN feature rows are live (rest are zero-padded lanes)
        o_ref[...] = jnp.sum(g0[:HIDDEN] * g1[:HIDDEN], axis=0, keepdims=True)

    return kernel


# ---------------------------------------------------------------------------
# Host-side prep (done ONCE): adjacency, weight pre-composition, padding, packing
# ---------------------------------------------------------------------------
def dense_mean_adj(edge_index, n_src, n_dst):
    """Dense row-normalized adjacency for PyG-style scatter-mean aggregation."""
    src, dst = edge_index[0], edge_index[1]
    a = jnp.zeros((n_dst, n_src), jnp.float32).at[dst, src].add(1.0)
    deg = a.sum(axis=1, keepdims=True)
    return a / jnp.maximum(deg, 1.0)


def _pad_lane(x):
    pad = LANE - x.shape[-1]
    return x if pad <= 0 else jnp.pad(x, ((0, 0), (0, pad)))


def _pad2(w):
    return jnp.pad(w, ((0, LANE - w.shape[0]), (0, LANE - w.shape[1])))


def _compose_sage(p):
    """Fold lin_neigh / lin_self into lin_update (exact: no nonlinearity between)."""
    h = p["w_update"].shape[0] // 2
    wu_n, wu_s = p["w_update"][:h], p["w_update"][h:]
    wc_n = p["w_neigh"] @ wu_n
    wc_s = p["w_self"] @ wu_s
    b_c = p["b_neigh"] @ wu_n + p["b_self"] @ wu_s + p["b_update"]
    return wc_n, wc_s, b_c


def prepare_hetero_net(node_feature, edge_index, edge_label_index, params1, params2):
    """Build the fused pallas_call and its packed operands. Call once; reuse."""
    node_types = sorted(node_feature.keys())
    nt_idx = {nt: i for i, nt in enumerate(node_types)}
    n_types = len(node_types)
    counts = {nt: node_feature[nt].shape[0] for nt in node_types}

    message_types = list(edge_index.keys())
    n_mt = len(message_types)
    mt_src = tuple(nt_idx[mt[0]] for mt in message_types)
    mt_dst = tuple(nt_idx[mt[2]] for mt in message_types)
    assert set(mt_dst) == set(range(n_types)), "every node type must be a conv dst"

    # mean-normalized adjacencies: graph structure, built ONCE, reused by both layers
    a_list = [dense_mean_adj(edge_index[mt], counts[mt[0]], counts[mt[2]])
              .astype(jnp.bfloat16) for mt in message_types]

    # pack ALL composed weights (both layers) into one bf16 tensor and all per-dst
    # summed biases into one f32 tensor -> few large DMAs instead of ~20 tiny ones.
    w_blocks, b_blocks = [], []
    for params in (params1, params2):
        wcn, wcs_sum, b_sum = [], [None] * n_types, [None] * n_types
        for mi, mt in enumerate(message_types):
            wc_n, wc_s, b_c = _compose_sage(params[mt])
            wcn.append(_pad2(wc_n))
            d = mt_dst[mi]
            wcs_sum[d] = wc_s if wcs_sum[d] is None else wcs_sum[d] + wc_s
            b_sum[d] = b_c if b_sum[d] is None else b_sum[d] + b_c
        w_blocks += wcn + [_pad2(w) for w in wcs_sum]
        b_blocks += [jnp.pad(b, ((0, 0), (0, LANE - b.shape[1]))) for b in b_sum]
    w_stack = jnp.stack(w_blocks).astype(jnp.bfloat16)   # (2*(n_mt+n_dst), 128, 128)
    b_stack = jnp.stack(b_blocks).astype(jnp.float32)    # (2*n_dst, 1, 128)

    # edge-label gather as one-hot selection matmuls; all label mts share one row
    lbl_mts = list(edge_label_index.keys())
    lbl_counts = [int(edge_label_index[mt].shape[1]) for mt in lbl_mts]
    e_total = sum(lbl_counts)
    e_pad = max(LANE, ((e_total + LANE - 1) // LANE) * LANE)
    n1 = counts["n1"]

    def sel(row):
        idx = jnp.concatenate([edge_label_index[mt][row] for mt in lbl_mts]).astype(jnp.int32)
        padded = jnp.full((e_pad,), -1, jnp.int32).at[:e_total].set(idx)
        return jnp.arange(n1, dtype=jnp.int32)[:, None] == padded[None, :]

    s_stack = jnp.stack([sel(0), sel(1)]).astype(jnp.bfloat16)   # 0/1 exact in bf16

    x_feats = [_pad_lane(node_feature[nt]).astype(jnp.float32) for nt in node_types]

    kernel = _build_fused_kernel(n_types, mt_src, mt_dst, score_idx=nt_idx["n1"])
    vmem = pl.BlockSpec(memory_space=pltpu.MemorySpace.VMEM)
    n_in = n_types + n_mt + 3
    # TODO(synk): for non-toy graphs this whole-array-resident call must become a
    # gridded (dst_tile, src_tile) reduction with an f32 VMEM accumulator, pl.when
    # init/finalize, dimension_semantics=("parallel","arbitrary") (parallel axis
    # shards across v7x's 2 TensorCores) and an explicit vmem_limit_bytes sized for
    # v7x's 64 MiB VMEM per TC.
    call = pl.pallas_call(
        kernel,
        out_shape=jax.ShapeDtypeStruct((1, e_pad), jnp.float32),
        in_specs=[vmem] * n_in,
        out_specs=vmem,
    )
    args = tuple(x_feats) + tuple(a_list) + (w_stack, b_stack, s_stack)
    meta = dict(lbl_mts=lbl_mts, lbl_counts=lbl_counts)
    return call, args, meta


def hetero_net_forward(call, args, meta):
    scores = call(*args)[0]          # (E_pad,) lane-dense row from the fused kernel
    pred, off = {}, 0
    for mt, n in zip(meta["lbl_mts"], meta["lbl_counts"]):
        pred[mt] = scores[off:off + n]
        off += n
    return pred


# ---------------------------------------------------------------------------
# Deterministic parameter init (HeteroSAGEConv: lin_neigh, lin_self, lin_update)
# ---------------------------------------------------------------------------
def init_sage_params(key, in_neigh, in_self, hidden):
    ks = jax.random.split(key, 6)

    def lin(kw, kb, fan_in, fan_out):
        bound = 1.0 / float(fan_in) ** 0.5
        w = jax.random.uniform(kw, (fan_in, fan_out), jnp.float32, -bound, bound)
        b = jax.random.uniform(kb, (1, fan_out), jnp.float32, -bound, bound)
        return w, b

    w_neigh, b_neigh = lin(ks[0], ks[1], in_neigh, hidden)
    w_self, b_self = lin(ks[2], ks[3], in_self, hidden)
    w_update, b_update = lin(ks[4], ks[5], 2 * hidden, hidden)
    return dict(w_neigh=w_neigh, b_neigh=b_neigh,
                w_self=w_self, b_self=b_self,
                w_update=w_update, b_update=b_update)


if __name__ == "__main__":
    key = jax.random.PRNGKey(0)

    hidden_size = HIDDEN
    node_feat_dims = {"n1": 12, "n2": 20}
    node_counts = {"n1": 24, "n2": 16}
    message_types = [("n1", "e1", "n1"), ("n2", "e2", "n1"), ("n1", "e3", "n2")]
    num_edges = 40
    num_label_edges = 10

    k_feat, k_edge, k_lbl, k_p1, k_p2 = jax.random.split(key, 5)
    feat_keys = jax.random.split(k_feat, len(node_counts))
    node_feature = {
        nt: jax.random.normal(fk, (node_counts[nt], node_feat_dims[nt]), jnp.float32)
        for fk, nt in zip(feat_keys, node_counts)
    }

    # edge indices per message type: row0 = src node ids, row1 = dst node ids
    edge_index = {}
    edge_keys = jax.random.split(k_edge, len(message_types))
    for ek, mt in zip(edge_keys, message_types):
        src_t, _, dst_t = mt
        k_s, k_d = jax.random.split(ek)
        src = jax.random.randint(k_s, (num_edges,), 0, node_counts[src_t])
        dst = jax.random.randint(k_d, (num_edges,), 0, node_counts[dst_t])
        edge_index[mt] = jnp.stack([src, dst], axis=0)

    # edge_label_index: the module indexes x['n1'] with both rows
    edge_label_index = {}
    lbl_keys = jax.random.split(k_lbl, 2)
    for lk, mt in zip(lbl_keys, message_types[:2]):
        edge_label_index[mt] = jax.random.randint(
            lk, (2, num_label_edges), 0, node_counts["n1"])

    # conv1: HeteroSAGEConv(feat_dim(src), hidden, feat_dim(dst))
    # conv2: HeteroSAGEConv(hidden, hidden, hidden)
    p1_keys = jax.random.split(k_p1, len(message_types))
    p2_keys = jax.random.split(k_p2, len(message_types))
    params1, params2 = {}, {}
    for pk1, pk2, mt in zip(p1_keys, p2_keys, message_types):
        src_t, _, dst_t = mt
        params1[mt] = init_sage_params(
            pk1, node_feat_dims[src_t], node_feat_dims[dst_t], hidden_size)
        params2[mt] = init_sage_params(pk2, hidden_size, hidden_size, hidden_size)

    # host prep (adjacencies, one-hot gathers, weight packing) happens ONCE here;
    # the forward itself is a single pallas_call.
    call, args, meta = prepare_hetero_net(
        node_feature, edge_index, edge_label_index, params1, params2)
    pred = hetero_net_forward(call, args, meta)
    pred = jax.block_until_ready(pred)

    for mt, v in pred.items():
        assert v.shape == (num_label_edges,), (mt, v.shape)
        assert v.dtype == jnp.float32
    print("KERNEL_OK")
</pallas_src>

<mosaic_0001>
module attributes {stable_mosaic.version = 11 : i64} {
  func.func @kernel(%arg0: memref<24x128xf32, #tpu.memory_space<vmem>>, %arg1: memref<16x128xf32, #tpu.memory_space<vmem>>, %arg2: memref<24x24xbf16, #tpu.memory_space<vmem>>, %arg3: memref<24x16xbf16, #tpu.memory_space<vmem>>, %arg4: memref<16x24xbf16, #tpu.memory_space<vmem>>, %arg5: memref<10x128x128xbf16, #tpu.memory_space<vmem>>, %arg6: memref<4x1x128xf32, #tpu.memory_space<vmem>>, %arg7: memref<2x24x128xbf16, #tpu.memory_space<vmem>>, %arg8: memref<1x128xf32, #tpu.memory_space<vmem>>) attributes {dimension_semantics = [], scalar_prefetch = 0 : i64, scratch_operands = 0 : i64, tpu.core_type = #tpu.core_type<tc>} {
    %c0 = arith.constant 0 : index
    %c0_0 = arith.constant 0 : index
    %0 = vector.load %arg2[%c0, %c0_0] : memref<24x24xbf16, #tpu.memory_space<vmem>>, vector<24x24xbf16>
    %c0_1 = arith.constant 0 : index
    %c0_2 = arith.constant 0 : index
    %1 = vector.load %arg3[%c0_1, %c0_2] : memref<24x16xbf16, #tpu.memory_space<vmem>>, vector<24x16xbf16>
    %c0_3 = arith.constant 0 : index
    %c0_4 = arith.constant 0 : index
    %2 = vector.load %arg4[%c0_3, %c0_4] : memref<16x24xbf16, #tpu.memory_space<vmem>>, vector<16x24xbf16>
    %c0_5 = arith.constant 0 : index
    %c0_6 = arith.constant 0 : index
    %3 = vector.load %arg0[%c0_5, %c0_6] : memref<24x128xf32, #tpu.memory_space<vmem>>, vector<24x128xf32>
    %c0_7 = arith.constant 0 : index
    %c0_8 = arith.constant 0 : index
    %4 = vector.load %arg1[%c0_7, %c0_8] : memref<16x128xf32, #tpu.memory_space<vmem>>, vector<16x128xf32>
    %cst = arith.constant 0.000000e+00 : f32
    %5 = vector.broadcast %cst : f32 to vector<24x128xf32>
    %6 = arith.cmpf oge, %3, %5 : vector<24x128xf32>
    %cst_9 = arith.constant 0.00999999977 : f32
    %7 = vector.broadcast %cst_9 : f32 to vector<24x128xf32>
    %8 = arith.mulf %7, %3 : vector<24x128xf32>
    %9 = arith.select %6, %3, %8 : vector<24x128xi1>, vector<24x128xf32>
    %10 = arith.truncf %9 : vector<24x128xf32> to vector<24x128xbf16>
    %cst_10 = arith.constant 0.000000e+00 : f32
    %11 = vector.broadcast %cst_10 : f32 to vector<16x128xf32>
    %12 = arith.cmpf oge, %4, %11 : vector<16x128xf32>
    %cst_11 = arith.constant 0.00999999977 : f32
    %13 = vector.broadcast %cst_11 : f32 to vector<16x128xf32>
    %14 = arith.mulf %13, %4 : vector<16x128xf32>
    %15 = arith.select %12, %4, %14 : vector<16x128xi1>, vector<16x128xf32>
    %16 = arith.truncf %15 : vector<16x128xf32> to vector<16x128xbf16>
    %c0_12 = arith.constant 0 : index
    %c0_13 = arith.constant 0 : index
    %c0_14 = arith.constant 0 : index
    %17 = vector.load %arg5[%c0_12, %c0_13, %c0_14] : memref<10x128x128xbf16, #tpu.memory_space<vmem>>, vector<1x128x128xbf16>
    %18 = vector.shape_cast %17 : vector<1x128x128xbf16> to vector<128x128xbf16>
    %cst_15 = arith.constant dense<0.000000e+00> : vector<24x128xf32>
    %19 = tpu.matmul %10, %18, %cst_15 {dimension_numbers = #tpu.dot_dimension_numbers<[1], [0], [0], [1], [0, 0, 1, 1], [], []>} : vector<24x128xbf16>, vector<128x128xbf16>, vector<24x128xf32> -> vector<24x128xf32>
    %20 = arith.truncf %19 : vector<24x128xf32> to vector<24x128xbf16>
    %cst_16 = arith.constant dense<0.000000e+00> : vector<24x128xf32>
    %21 = tpu.matmul %0, %20, %cst_16 {dimension_numbers = #tpu.dot_dimension_numbers<[1], [0], [0], [1], [0, 0, 1, 1], [], []>} : vector<24x24xbf16>, vector<24x128xbf16>, vector<24x128xf32> -> vector<24x128xf32>
    %c1 = arith.constant 1 : index
    %c0_17 = arith.constant 0 : index
    %c0_18 = arith.constant 0 : index
    %22 = vector.load %arg5[%c1, %c0_17, %c0_18] : memref<10x128x128xbf16, #tpu.memory_space<vmem>>, vector<1x128x128xbf16>
    %23 = vector.shape_cast %22 : vector<1x128x128xbf16> to vector<128x128xbf16>
    %cst_19 = arith.constant dense<0.000000e+00> : vector<16x128xf32>
    %24 = tpu.matmul %16, %23, %cst_19 {dimension_numbers = #tpu.dot_dimension_numbers<[1], [0], [0], [1], [0, 0, 1, 1], [], []>} : vector<16x128xbf16>, vector<128x128xbf16>, vector<16x128xf32> -> vector<16x128xf32>
    %25 = arith.truncf %24 : vector<16x128xf32> to vector<16x128xbf16>
    %cst_20 = arith.constant dense<0.000000e+00> : vector<24x128xf32>
    %26 = tpu.matmul %1, %25, %cst_20 {dimension_numbers = #tpu.dot_dimension_numbers<[1], [0], [0], [1], [0, 0, 1, 1], [], []>} : vector<24x16xbf16>, vector<16x128xbf16>, vector<24x128xf32> -> vector<24x128xf32>
    %27 = arith.addf %21, %26 : vector<24x128xf32>
    %c2 = arith.constant 2 : index
    %c0_21 = arith.constant 0 : index
    %c0_22 = arith.constant 0 : index
    %28 = vector.load %arg5[%c2, %c0_21, %c0_22] : memref<10x128x128xbf16, #tpu.memory_space<vmem>>, vector<1x128x128xbf16>
    %29 = vector.shape_cast %28 : vector<1x128x128xbf16> to vector<128x128xbf16>
    %cst_23 = arith.constant dense<0.000000e+00> : vector<24x128xf32>
    %30 = tpu.matmul %10, %29, %cst_23 {dimension_numbers = #tpu.dot_dimension_numbers<[1], [0], [0], [1], [0, 0, 1, 1], [], []>} : vector<24x128xbf16>, vector<128x128xbf16>, vector<24x128xf32> -> vector<24x128xf32>
    %31 = arith.truncf %30 : vector<24x128xf32> to vector<24x128xbf16>
    %cst_24 = arith.constant dense<0.000000e+00> : vector<16x128xf32>
    %32 = tpu.matmul %2, %31, %cst_24 {dimension_numbers = #tpu.dot_dimension_numbers<[1], [0], [0], [1], [0, 0, 1, 1], [], []>} : vector<16x24xbf16>, vector<24x128xbf16>, vector<16x128xf32> -> vector<16x128xf32>
    %c3 = arith.constant 3 : index
    %c0_25 = arith.constant 0 : index
    %c0_26 = arith.constant 0 : index
    %33 = vector.load %arg5[%c3, %c0_25, %c0_26] : memref<10x128x128xbf16, #tpu.memory_space<vmem>>, vector<1x128x128xbf16>
    %34 = vector.shape_cast %33 : vector<1x128x128xbf16> to vector<128x128xbf16>
    %cst_27 = arith.constant dense<0.000000e+00> : vector<24x128xf32>
    %35 = tpu.matmul %10, %34, %cst_27 {dimension_numbers = #tpu.dot_dimension_numbers<[1], [0], [0], [1], [0, 0, 1, 1], [], []>} : vector<24x128xbf16>, vector<128x128xbf16>, vector<24x128xf32> -> vector<24x128xf32>
    %36 = arith.addf %27, %35 : vector<24x128xf32>
    %c0_28 = arith.constant 0 : index
    %c0_29 = arith.constant 0 : index
    %c0_30 = arith.constant 0 : index
    %37 = vector.load %arg6[%c0_28, %c0_29, %c0_30] : memref<4x1x128xf32, #tpu.memory_space<vmem>>, vector<1x1x128xf32>
    %38 = vector.shape_cast %37 : vector<1x1x128xf32> to vector<1x128xf32>
    %39 = vector.broadcast %38 : vector<1x128xf32> to vector<24x128xf32>
    %40 = arith.addf %36, %39 : vector<24x128xf32>
    %c4 = arith.constant 4 : index
    %c0_31 = arith.constant 0 : index
    %c0_32 = arith.constant 0 : index
    %41 = vector.load %arg5[%c4, %c0_31, %c0_32] : memref<10x128x128xbf16, #tpu.memory_space<vmem>>, vector<1x128x128xbf16>
    %42 = vector.shape_cast %41 : vector<1x128x128xbf16> to vector<128x128xbf16>
    %cst_33 = arith.constant dense<0.000000e+00> : vector<16x128xf32>
    %43 = tpu.matmul %16, %42, %cst_33 {dimension_numbers = #tpu.dot_dimension_numbers<[1], [0], [0], [1], [0, 0, 1, 1], [], []>} : vector<16x128xbf16>, vector<128x128xbf16>, vector<16x128xf32> -> vector<16x128xf32>
    %44 = arith.addf %32, %43 : vector<16x128xf32>
    %c1_34 = arith.constant 1 : index
    %c0_35 = arith.constant 0 : index
    %c0_36 = arith.constant 0 : index
    %45 = vector.load %arg6[%c1_34, %c0_35, %c0_36] : memref<4x1x128xf32, #tpu.memory_space<vmem>>, vector<1x1x128xf32>
    %46 = vector.shape_cast %45 : vector<1x1x128xf32> to vector<1x128xf32>
    %47 = vector.broadcast %46 : vector<1x128xf32> to vector<16x128xf32>
    %48 = arith.addf %44, %47 : vector<16x128xf32>
    %cst_37 = arith.constant 0.000000e+00 : f32
    %49 = vector.broadcast %cst_37 : f32 to vector<24x128xf32>
    %50 = arith.cmpf oge, %40, %49 : vector<24x128xf32>
    %cst_38 = arith.constant 0.00999999977 : f32
    %51 = vector.broadcast %cst_38 : f32 to vector<24x128xf32>
    %52 = arith.mulf %51, %40 : vector<24x128xf32>
    %53 = arith.select %50, %40, %52 : vector<24x128xi1>, vector<24x128xf32>
    %54 = arith.truncf %53 : vector<24x128xf32> to vector<24x128xbf16>
    %cst_39 = arith.constant 0.000000e+00 : f32
    %55 = vector.broadcast %cst_39 : f32 to vector<16x128xf32>
    %56 = arith.cmpf oge, %48, %55 : vector<16x128xf32>
    %cst_40 = arith.constant 0.00999999977 : f32
    %57 = vector.broadcast %cst_40 : f32 to vector<16x128xf32>
    %58 = arith.mulf %57, %48 : vector<16x128xf32>
    %59 = arith.select %56, %48, %58 : vector<16x128xi1>, vector<16x128xf32>
    %60 = arith.truncf %59 : vector<16x128xf32> to vector<16x128xbf16>
    %c5 = arith.constant 5 : index
    %c0_41 = arith.constant 0 : index
    %c0_42 = arith.constant 0 : index
    %61 = vector.load %arg5[%c5, %c0_41, %c0_42] : memref<10x128x128xbf16, #tpu.memory_space<vmem>>, vector<1x128x128xbf16>
    %62 = vector.shape_cast %61 : vector<1x128x128xbf16> to vector<128x128xbf16>
    %cst_43 = arith.constant dense<0.000000e+00> : vector<24x128xf32>
    %63 = tpu.matmul %54, %62, %cst_43 {dimension_numbers = #tpu.dot_dimension_numbers<[1], [0], [0], [1], [0, 0, 1, 1], [], []>} : vector<24x128xbf16>, vector<128x128xbf16>, vector<24x128xf32> -> vector<24x128xf32>
    %64 = arith.truncf %63 : vector<24x128xf32> to vector<24x128xbf16>
    %cst_44 = arith.constant dense<0.000000e+00> : vector<24x128xf32>
    %65 = tpu.matmul %0, %64, %cst_44 {dimension_numbers = #tpu.dot_dimension_numbers<[1], [0], [0], [1], [0, 0, 1, 1], [], []>} : vector<24x24xbf16>, vector<24x128xbf16>, vector<24x128xf32> -> vector<24x128xf32>
    %c6 = arith.constant 6 : index
    %c0_45 = arith.constant 0 : index
    %c0_46 = arith.constant 0 : index
    %66 = vector.load %arg5[%c6, %c0_45, %c0_46] : memref<10x128x128xbf16, #tpu.memory_space<vmem>>, vector<1x128x128xbf16>
    %67 = vector.shape_cast %66 : vector<1x128x128xbf16> to vector<128x128xbf16>
    %cst_47 = arith.constant dense<0.000000e+00> : vector<16x128xf32>
    %68 = tpu.matmul %60, %67, %cst_47 {dimension_numbers = #tpu.dot_dimension_numbers<[1], [0], [0], [1], [0, 0, 1, 1], [], []>} : vector<16x128xbf16>, vector<128x128xbf16>, vector<16x128xf32> -> vector<16x128xf32>
    %69 = arith.truncf %68 : vector<16x128xf32> to vector<16x128xbf16>
    %cst_48 = arith.constant dense<0.000000e+00> : vector<24x128xf32>
    %70 = tpu.matmul %1, %69, %cst_48 {dimension_numbers = #tpu.dot_dimension_numbers<[1], [0], [0], [1], [0, 0, 1, 1], [], []>} : vector<24x16xbf16>, vector<16x128xbf16>, vector<24x128xf32> -> vector<24x128xf32>
    %71 = arith.addf %65, %70 : vector<24x128xf32>
    %c8 = arith.constant 8 : index
    %c0_49 = arith.constant 0 : index
    %c0_50 = arith.constant 0 : index
    %72 = vector.load %arg5[%c8, %c0_49, %c0_50] : memref<10x128x128xbf16, #tpu.memory_space<vmem>>, vector<1x128x128xbf16>
    %73 = vector.shape_cast %72 : vector<1x128x128xbf16> to vector<128x128xbf16>
    %cst_51 = arith.constant dense<0.000000e+00> : vector<24x128xf32>
    %74 = tpu.matmul %54, %73, %cst_51 {dimension_numbers = #tpu.dot_dimension_numbers<[1], [0], [0], [1], [0, 0, 1, 1], [], []>} : vector<24x128xbf16>, vector<128x128xbf16>, vector<24x128xf32> -> vector<24x128xf32>
    %75 = arith.addf %71, %74 : vector<24x128xf32>
    %c2_52 = arith.constant 2 : index
    %c0_53 = arith.constant 0 : index
    %c0_54 = arith.constant 0 : index
    %76 = vector.load %arg6[%c2_52, %c0_53, %c0_54] : memref<4x1x128xf32, #tpu.memory_space<vmem>>, vector<1x1x128xf32>
    %77 = vector.shape_cast %76 : vector<1x1x128xf32> to vector<1x128xf32>
    %78 = vector.broadcast %77 : vector<1x128xf32> to vector<24x128xf32>
    %79 = arith.addf %75, %78 : vector<24x128xf32>
    %80 = arith.truncf %79 : vector<24x128xf32> to vector<24x128xbf16>
    %c0_55 = arith.constant 0 : index
    %c0_56 = arith.constant 0 : index
    %c0_57 = arith.constant 0 : index
    %81 = vector.load %arg7[%c0_55, %c0_56, %c0_57] : memref<2x24x128xbf16, #tpu.memory_space<vmem>>, vector<1x24x128xbf16>
    %82 = vector.shape_cast %81 : vector<1x24x128xbf16> to vector<24x128xbf16>
    %cst_58 = arith.constant dense<0.000000e+00> : vector<128x128xf32>
    %83 = tpu.matmul %80, %82, %cst_58 {dimension_numbers = #tpu.dot_dimension_numbers<[0], [0], [1], [1], [0, 1, 1, 1], [], []>} : vector<24x128xbf16>, vector<24x128xbf16>, vector<128x128xf32> -> vector<128x128xf32>
    %c1_59 = arith.constant 1 : index
    %c0_60 = arith.constant 0 : index
    %c0_61 = arith.constant 0 : index
    %84 = vector.load %arg7[%c1_59, %c0_60, %c0_61] : memref<2x24x128xbf16, #tpu.memory_space<vmem>>, vector<1x24x128xbf16>
    %85 = vector.shape_cast %84 : vector<1x24x128xbf16> to vector<24x128xbf16>
    %cst_62 = arith.constant dense<0.000000e+00> : vector<128x128xf32>
    %86 = tpu.matmul %80, %85, %cst_62 {dimension_numbers = #tpu.dot_dimension_numbers<[0], [0], [1], [1], [0, 1, 1, 1], [], []>} : vector<24x128xbf16>, vector<24x128xbf16>, vector<128x128xf32> -> vector<128x128xf32>
    %87 = vector.extract_strided_slice %83 {offsets = [0, 0], sizes = [32, 128], strides = [1, 1]} : vector<128x128xf32> to vector<32x128xf32>
    %88 = vector.extract_strided_slice %86 {offsets = [0, 0], sizes = [32, 128], strides = [1, 1]} : vector<128x128xf32> to vector<32x128xf32>
    %89 = arith.mulf %87, %88 : vector<32x128xf32>
    %cst_63 = arith.constant dense<0.000000e+00> : vector<128xf32>
    %90 = vector.multi_reduction <add>, %89, %cst_63 [0] : vector<32x128xf32> to vector<128xf32>
    %91 = vector.shape_cast %90 : vector<128xf32> to vector<1x128xf32>
    %c0_64 = arith.constant 0 : index
    %c0_65 = arith.constant 0 : index
    %92 = vector.load %arg8[%c0_64, %c0_65] : memref<1x128xf32, #tpu.memory_space<vmem>>, vector<1x128xf32>
    tpu.vector_store %arg8[%c0_64, %c0_65], %91 {strides = array<i32>} : memref<1x128xf32, #tpu.memory_space<vmem>>, vector<1x128xf32>,
    return
  }
}

</mosaic_0001>

<bundles_post_ra>
// kernel: tpu_custom_call.1
= control target key start
LH: loop header
LB: loop body
LE: loop exit
PB: predicated region body
PF: predicated region fallthrough
CT: control target
= control target key end

     0   :  { %13 = vsyncpa [#allocation3], 0  ;;  %s1911_s0 = inlined_call_operand.hbm [shape: f32[24,128], index: 0, kind: input, shape index: {}]   ;;  %s1912_s1 = inlined_call_operand.hbm [shape: f32[16,128], index: 1, kind: input, shape index: {}]   ;;  %s1913_s2 = inlined_call_operand.hbm [shape: bf16[24,24], index: 2, kind: input, shape index: {}]   ;;  %s1914_s3 = inlined_call_operand.vmem [shape: bf16[24,16], index: 3, kind: input, shape index: {}]   ;;  %s1915_s4 = inlined_call_operand.hbm [shape: bf16[16,24], index: 4, kind: input, shape index: {}]   ;;  %s1916_s5 = inlined_call_operand.hbm [shape: bf16[10,128,128], index: 5, kind: input, shape index: {}]   ;;  %s1917_s6 = inlined_call_operand.hbm [shape: f32[4,1,128], index: 6, kind: input, shape index: {}]   ;;  %s1918_s7 = inlined_call_operand.vmem [shape: bf16[2,24,128], index: 7, kind: input, shape index: {}]   ;;  %s1919_s8 = inlined_call_operand.hbm [shape: f32[1,128], index: 8, kind: output, shape index: {}]  }
   0x1   :  { %14 = vsyncpa [#allocation6], 0 }
   0x2   :  { %15 = vsyncpa [#allocation9], 0 }
   0x3   :  { %16 = vsyncpa [#allocation12], 0 }
   0x4   :  { %17 = vsyncpa [#allocation4], 0  ;;  %s35_s29 = sshll.u32 %s1912_s1, 4  ;;  %s1746_s30 = smov [#allocation5]   ;;  %s36_s29 = int_to_ptr.hbm [resolvable:$true] %s35_s29 }
   0x5   :  { %s37_s9 = sshll.u32 %s1746_s30, 4  ;;  %s1747_s10 = smov 128   ;;  %s38_s9 = int_to_ptr.vmem [resolvable:$true] %s37_s9 }
   0x6   :  { %s1748_s11 = smov 8   ;;  %s63_s14 = sshll.u32 %s1915_s4, 4  ;;  %s64_s14 = int_to_ptr.hbm [resolvable:$true] %s63_s14 }
   0x7   :  { %43 = dma.hbm_to_vmem [thread:$0]  %s36_s29, 256, %s38_s9, [#allocation6], %s1747_s10, %s1747_s10, %s1748_s11  }
   0x8   :  { %s1749_s15 = smov [#allocation8]   ;;  %s22_s19 = sshll.u32 %s1911_s0, 4  ;;  %s23_s19 = int_to_ptr.hbm [resolvable:$true] %s22_s19 }
   0x9   :  { %s65_s16 = sshll.u32 %s1749_s15, 4  ;;  %s1750_s1 = smov 64   ;;  %s66_s16 = int_to_ptr.vmem [resolvable:$true] %s65_s16 }
   0xa   :  { %s1751_s20 = smov 4   ;;  %s48_s23 = sshll.u32 %s1913_s2, 4  ;;  %s49_s23 = int_to_ptr.hbm [resolvable:$true] %s48_s23 }
   0xb   :  { %71 = dma.hbm_to_vmem [thread:$0]  %s64_s14, 128, %s66_s16, [#allocation9], %s1750_s1, %s1750_s1, %s1751_s20  }
   0xc   :  { %s1752_s24 = smov [#allocation2]   ;;  %s1753_s4 = smov [#allocation7]  }
   0xd   :  { %s24_s25 = sshll.u32 %s1752_s24, 4  ;;  %s50_s26 = sshll.u32 %s1753_s4, 4  ;;  %s25_s25 = int_to_ptr.vmem [resolvable:$true] %s24_s25  ;;  %s51_s26 = int_to_ptr.vmem [resolvable:$true] %s50_s26 }
   0xe   :  { %30 = dma.hbm_to_vmem [thread:$0]  %s23_s19, 384, %s25_s25, [#allocation3], %s1747_s10, %s1747_s10, %s1748_s11  }
   0xf   :  { %s76_s0 = sshll.u32 %s1916_s5, 4  ;;  %s89_s9 = sshll.u32 %s1917_s6, 4  ;;  %s77_s0 = int_to_ptr.hbm [resolvable:$true] %s76_s0  ;;  %s90_s9 = int_to_ptr.hbm [resolvable:$true] %s89_s9 }
  0x10   :  { %56 = dma.hbm_to_vmem [thread:$0]  %s49_s23, 192, %s51_s26, [#allocation6], %s1750_s1, %s1750_s1, %s1751_s20  }
  0x11   :  { %s1754_s12 = smov [#allocation10]   ;;  %s1755_s13 = smov [#allocation11]  }
  0x12   :  { %s78_s2 = sshll.u32 %s1754_s12, 4  ;;  %s91_s10 = sshll.u32 %s1755_s13, 4  ;;  %s79_s2 = int_to_ptr.vmem [resolvable:$true] %s78_s2  ;;  %s92_s10 = int_to_ptr.vmem [resolvable:$true] %s91_s10 }
  0x13   :  { %84 = dma.hbm_to_vmem [thread:$0]  %s77_s0, 10240, %s79_s2, [#allocation9], %s1750_s1, %s1750_s1, %s1751_s20  }
  0x14   :  { %s1756_s11 = smov 16   ;;  %s1757_s14 = smov 1  }
  0x15   :  { %97 = dma.hbm_to_vmem [thread:$0]  %s90_s9, 64, %s92_s10, [#allocation12], %s1756_s11, %s1756_s11, %s1757_s14  }
  0x16   :  { %1736 = dma.done.wait [#allocation3], 384  }
  0x17   :  { %1737 = vsyncadd [#allocation3], 4294966912 }
  0x18   :  { %1738 = dma.done.wait [#allocation6], 448  }
  0x19   :  { %1739 = vsyncadd [#allocation6], 4294966848 }
  0x1a   :  { %1740 = dma.done.wait [#allocation9], 10368  }
  0x1b   :  { %1741 = vsyncadd [#allocation9], 4294956928 }
  0x1c   :  { %1742 = dma.done.wait [#allocation12], 64  }
  0x1d   :  { %1743 = vsyncadd [#allocation12], 4294967232  ;;  %v1490_v0 = vld [vmem:[#allocation10 + $0x38] sm:$0xff]  ;;  %v1489_v2 = vld [vmem:[#allocation10 + $0x30] sm:$0xff]  ;;  %vm328_vm5 = vcmask 130048   ;;  %vm368_vm6 = vcmask 1043456  }
  0x1e   :  { %v1498_v1 = vld [vmem:[#allocation10 + $0x78] sm:$0xff]  ;;  %220 = vmatpush.bf16.msra.mxu0 %v1490_v0  ;;  %v1497_v3 = vld [vmem:[#allocation10 + $0x70] sm:$0xff]  ;;  %v1488_v4 = vld [vmem:[#allocation10 + $0x28] sm:$0xff]  ;;  %vm361_vm7 = vcmask 195584   ;;  %s1163_s4 = sshll.u32 %s1919_s8, 4  ;;  %s1164_s4 = int_to_ptr.hbm [resolvable:$true] %s1163_s4 }
  0x1f   :  { %305 = vmatpush.bf16.msra.mxu1 %v1498_v1  ;;  %v1496_v5 = vld [vmem:[#allocation10 + $0x68] sm:$0xff]  ;;  %v1487_v6 = vld [vmem:[#allocation10 + $0x20] sm:$0xff]  ;;  %v1486_v8 = vld [vmem:[#allocation10 + $0x18] sm:$0xff] }
  0x20   :  { %v1495_v7 = vld [vmem:[#allocation10 + $0x60] sm:$0xff]  ;;  %v1494_v9 = vld [vmem:[#allocation10 + $0x58] sm:$0xff]  ;;  %v1485_v10 = vld [vmem:[#allocation10 + $0x10] sm:$0xff] }
  0x21   :  { %v1493_v11 = vld [vmem:[#allocation10 + $0x50] sm:$0xff]  ;;  %v133_v12 = vld [vmem:[#allocation2] sm:$0xff]  ;;  %v136_v14 = vld [vmem:[#allocation5] sm:$0xff] }
  0x22   :  { %221 = vmatpush.bf16.msra.mxu0 %v1489_v2  ;;  %v134_v13 = vld [vmem:[#allocation2 + $0x8] sm:$0xff]  ;;  %v137_v15 = vld [vmem:[#allocation5 + $0x8] sm:$0xff]  ;;  %vm138_vm0 = vcmp.ge.f32.partialorder %v133_v12, 0.0  ;;  %v141_v18 = vmul.f32 0.01, %v133_v12  ;;  %vm149_vm2 = vcmp.ge.f32.partialorder %v136_v14, 0.0 }
  0x23   :  { %306 = vmatpush.bf16.msra.mxu1 %v1497_v3  ;;  %v1484_v16 = vld [vmem:[#allocation10 + $0x8] sm:$0xff]  ;;  %v142_v19 = vmul.f32 0.01, %v134_v13  ;;  %v151_v20 = vmul.f32 0.01, %v136_v14  ;;  %vm139_vm1 = vcmp.ge.f32.partialorder %v134_v13, 0.0 }
  0x24   :  { %v1492_v17 = vld [vmem:[#allocation10 + $0x48] sm:$0xff]  ;;  %v152_v21 = vmul.f32 0.01, %v137_v15  ;;  %vm150_vm3 = vcmp.ge.f32.partialorder %v137_v15, 0.0  ;;  %v144_v22 = vsel %vm138_vm0, %v133_v12, %v141_v18  ;;  %v1483_v23 = vld [vmem:[#allocation10] sm:$0xff]  ;;  %v135_v30 = vld [vmem:[#allocation2 + $0x10] sm:$0xff] }
  0x25   :  { %v1491_v24 = vld [vmem:[#allocation10 + $0x40] sm:$0xff]  ;;  %v145_v25 = vsel %vm139_vm1, %v134_v13, %v142_v19  ;;  %v153_v26 = vsel %vm149_vm2, %v136_v14, %v151_v20  ;;  %v143_v31 = vmul.f32 0.01, %v135_v30  ;;  %vm140_vm4 = vcmp.ge.f32.partialorder %v135_v30, 0.0  ;;  %v1514_v34 = vld [vmem:[#allocation10 + $0xf8] sm:$0xff]  ;;  %v1513_v35 = vld [vmem:[#allocation10 + $0xf0] sm:$0xff] }
  0x26   :  { %222 = vmatpush.bf16.msra.mxu0 %v1488_v4  ;;  %v154_v27 = vsel %vm150_vm3, %v137_v15, %v152_v21  ;;  %v1822_v28 = vpack.c.bf16 %v145_v25, %v144_v22  ;;  %v1512_v36 = vld [vmem:[#allocation10 + $0xe8] sm:$0xff]  ;;  %v1511_v37 = vld [vmem:[#allocation10 + $0xe0] sm:$0xff]  ;;  %v1510_v38 = vld [vmem:[#allocation10 + $0xd8] sm:$0xff] }
  0x27   :  { %307 = vmatpush.bf16.msra.mxu1 %v1496_v5  ;;  %v1824_v29 = vpack.c.bf16 %v154_v27, %v153_v26  ;;  %v146_v32 = vsel %vm140_vm4, %v135_v30, %v143_v31  ;;  %v1509_v39 = vld [vmem:[#allocation10 + $0xd0] sm:$0xff]  ;;  %v1508_v40 = vld [vmem:[#allocation10 + $0xc8] sm:$0xff]  ;;  %v1507_v41 = vld [vmem:[#allocation10 + $0xc0] sm:$0xff] }
  0x28   :  { %v1828_v33 = vpack.c.bf16 %v146_v32, %v146_v32  ;;  %v1506_v46 = vld [vmem:[#allocation10 + $0xb8] sm:$0xff]  ;;  %v1835_v48 = vld [vmem:[%s1914_s3] sm:$0xff]  ;;  %v1505_v49 = vld [vmem:[#allocation10 + $0xb0] sm:$0xff] }
  0x29   :  { %v1504_v51 = vld [vmem:[#allocation10 + $0xa8] sm:$0xff]  ;;  %v1503_v56 = vld [vmem:[#allocation10 + $0xa0] sm:$0xff]  ;;  %v1502_v59 = vld [vmem:[#allocation10 + $0x98] sm:$0xff] }
  0x2a   :  { %223 = vmatpush.bf16.msra.mxu0 %v1487_v6  ;;  %v130_v54 = vld [vmem:[%s1914_s3 + $0x8] sm:$0xf]  ;;  %v1501_v62 = vld [vmem:[#allocation10 + $0x90] sm:$0xff]  ;;  %v1499_v2 = vld [vmem:[#allocation10 + $0x80] sm:$0xff] }
  0x2b   :  { %308 = vmatpush.bf16.msra.mxu1 %v1495_v7  ;;  %v325_v57 = vunpack.c.l.b16 %v130_v54  ;;  %v1844_v58 = vld [vmem:[#allocation7] sm:$0xff]  ;;  %v127_v0 = vld [vmem:[#allocation7 + $0x8] sm:$0xf]  ;;  %v1530_v4 = vld [vmem:[#allocation10 + $0x178] sm:$0xff] }
  0x2c   :  { %v1500_v63 = vld [vmem:[#allocation10 + $0x88] sm:$0xff]  ;;  %v358_v1 = vunpack.c.l.b16 %v127_v0  ;;  %v1529_v5 = vld [vmem:[#allocation10 + $0x170] sm:$0xff]  ;;  %v1527_v7 = vld [vmem:[#allocation10 + $0x160] sm:$0xff] }
  0x2d   :  { %v1846_v61 = vpack.c.b16 %v325_v57, %v325_v57  ;;  %v1528_v6 = vld [vmem:[#allocation10 + $0x168] sm:$0xff]  ;;  %v1521_v12 = vld [vmem:[#allocation10 + $0x130] sm:$0xff]  ;;  %v1518_v20 = vld [vmem:[#allocation10 + $0x118] sm:$0xff] }
  0x2e   :  { %224 = vmatpush.bf16.msra.mxu0 %v1486_v8  ;;  %v1852_v3 = vpack.c.b16 %v358_v1, %v358_v1  ;;  %v1524_v14 = vld [vmem:[#allocation10 + $0x148] sm:$0xff]  ;;  %v1517_v21 = vld [vmem:[#allocation10 + $0x110] sm:$0xff]  ;;  %v1515_v27 = vld [vmem:[#allocation10 + $0x100] sm:$0xff] }
  0x2f   :  { %309 = vmatpush.bf16.msra.mxu1 %v1494_v9  ;;  %v1526_v9 = vld [vmem:[#allocation10 + $0x158] sm:$0xff]  ;;  %v1520_v15 = vld [vmem:[#allocation10 + $0x128] sm:$0xff]  ;;  %v1565_v31 = vld [vmem:[#allocation11] ss:$0 sm:$0xff] }
  0x30   :  { %v1482_v57 = vld [vmem:[#allocation8] sm:$0xff]  ;;  %v1535_v0 = vld [vmem:[#allocation10 + $0x1a0] sm:$0xff] }
  0x31   :  { %v1534_v1 = vld [vmem:[#allocation10 + $0x198] sm:$0xff] }
  0x32   :  { %225 = vmatpush.bf16.msra.mxu0 %v1485_v10  ;;  %v1522_v10 = vld [vmem:[#allocation10 + $0x138] sm:$0xff] }
  0x33   :  { %310 = vmatpush.bf16.msra.mxu1 %v1493_v11  ;;  %v1525_v11 = vld [vmem:[#allocation10 + $0x150] sm:$0xff] }
  0x36   :  { %226 = vmatpush.bf16.msra.mxu0 %v1484_v16  ;;  %v1523_v16 = vld [vmem:[#allocation10 + $0x140] sm:$0xff] }
  0x37   :  { %311 = vmatpush.bf16.msra.mxu1 %v1492_v17  ;;  %v1519_v17 = vld [vmem:[#allocation10 + $0x120] sm:$0xff] }
  0x3a   :  { %227 = vmatpush.bf16.msra.mxu0 %v1483_v23 }
  0x3b   :  { %312 = vmatpush.bf16.msra.mxu1 %v1491_v24  ;;  %v1516_v24 = vld [vmem:[#allocation10 + $0x108] sm:$0xff] }
  0x3d   :  { %228 = vmatmul.bf16.vlgmr.msra.gmra.mxu0 %v1822_v28 }
  0x3e   :  { %313 = vmatmul.bf16.vlgmr.msra.gmra.mxu1 %v1824_v29  ;;  %633 = vmatpush.bf16.msrb.mxu0 %v1522_v10 }
  0x3f   :  { %540 = vmatpush.bf16.msrb.mxu1 %v1514_v34 }
  0x42   :  { %634 = vmatpush.bf16.msrb.mxu0 %v1521_v12 }
  0x43   :  { %541 = vmatpush.bf16.msrb.mxu1 %v1513_v35 }
  0x46   :  { %635 = vmatpush.bf16.msrb.mxu0 %v1520_v15  ;;  %v1566_v15 = vld [vmem:[#allocation11 + $0x1] ss:$0 sm:$0xff] }
  0x47   :  { %542 = vmatpush.bf16.msrb.mxu1 %v1512_v36 }
  0x4a   :  { %636 = vmatpush.bf16.msrb.mxu0 %v1519_v17 }
  0x4b   :  { %543 = vmatpush.bf16.msrb.mxu1 %v1511_v37 }
  0x4d   :  { %233 = vmatmul.bf16.gmra.mxu0 %v1828_v33 }
  0x4e   :  { %637 = vmatpush.bf16.msrb.mxu0 %v1518_v20 }
  0x4f   :  { %544 = vmatpush.bf16.msrb.mxu1 %v1510_v38 }
  0x52   :  { %638 = vmatpush.bf16.msrb.mxu0 %v1517_v21 }
  0x53   :  { %545 = vmatpush.bf16.msrb.mxu1 %v1509_v39 }
  0x56   :  { %639 = vmatpush.bf16.msrb.mxu0 %v1516_v24 }
  0x57   :  { %546 = vmatpush.bf16.msrb.mxu1 %v1508_v40 }
  0x5a   :  { %640 = vmatpush.bf16.msrb.mxu0 %v1515_v27 }
  0x5b   :  { %547 = vmatpush.bf16.msrb.mxu1 %v1507_v41 }
  0x5d   :  { %641 = vmatmul.bf16.vlgmr.msrb.gmra.mxu0 %v1824_v29 }
  0x5e   :  { %548 = vmatmul.bf16.vlgmr.msrb.gmra.mxu1 %v1822_v28 }
  0x6e   :  { %553 = vmatmul.bf16.gmra.mxu1 %v1828_v33 }
  0xba   :  { %v229_v42 = vpop.f32.mrf.mxu0 }
  0xbb   :  { %v314_v43 = vpop.f32.mrf.mxu1 }
  0xc2   :  { %v231_v44 = vpop.f32.mrf.mxu0 }
  0xc3   :  { %v316_v45 = vpop.f32.mrf.mxu1  ;;  %v238_v55 = vpack.c.bf16 %v231_v44, %v229_v42 }
  0xc4   :  { %v319_v47 = vpack.c.bf16 %v316_v45, %v314_v43 }
  0xc6   :  { %342 = vmatpush.bf16.msra.mxu2 %v319_v47 }
  0xc9   :  { %1244 = vmatmul.msk.bf16.vlgmr.msra.gmra.mxu2 %vm328_vm5, %v1835_v48 }
  0xca   :  { %455 = vmatpush.bf16.msrb.mxu2 %v1506_v46  ;;  %v234_v50 = vpop.f32.mrf.mxu0 }
  0xcb   :  { %v239_v52 = vpack.c.bf16 %v234_v50, %v234_v50 }
  0xcd   :  { %v370_v53 = vsel %vm368_vm6, %v239_v52, 0 }
  0xce   :  { %456 = vmatpush.bf16.msrb.mxu2 %v1505_v49  ;;  %378 = vmatpush.bf16.msra.mxu3 %v370_v53 }
  0xd2   :  { %457 = vmatpush.bf16.msrb.mxu2 %v1504_v51  ;;  %379 = vmatpush.bf16.msra.mxu3 %v238_v55  ;;  %v236_v60 = vpop.f32.mrf.mxu0 }
  0xd3   :  { %v1538_v60 = vld [vmem:[#allocation10 + $0x1b8] sm:$0xff] }
  0xd5   :  { %1250 = vmatmul.msk.bf16.vlgmr.msra.gmra.mxu3 %vm361_vm7, %v1844_v58 }
  0xd6   :  { %458 = vmatpush.bf16.msrb.mxu2 %v1503_v56  ;;  %847 = vmatpush.bf16.msrb.mxu3 %v1538_v60 }
  0xd9   :  { %1245 = vmatmul.msk.bf16.gmra.mxu2 %vm328_vm5, %v1846_v61 }
  0xda   :  { %459 = vmatpush.bf16.msrb.mxu2 %v1502_v59  ;;  %v642_v10 = vpop.f32.mrf.mxu0 }
  0xdb   :  { %v549_v8 = vpop.f32.mrf.mxu1 }
  0xde   :  { %460 = vmatpush.bf16.msrb.mxu2 %v1501_v62  ;;  %v1537_v62 = vld [vmem:[#allocation10 + $0x1b0] sm:$0xff] }
  0xdf   :  { %848 = vmatpush.bf16.msrb.mxu3 %v1537_v62 }
  0xe2   :  { %461 = vmatpush.bf16.msrb.mxu2 %v1500_v63  ;;  %v1536_v63 = vld [vmem:[#allocation10 + $0x1a8] sm:$0xff] }
  0xe3   :  { %v551_v13 = vpop.f32.mrf.mxu1  ;;  %849 = vmatpush.bf16.msrb.mxu3 %v1536_v63 }
  0xe5   :  { %1251 = vmatmul.msk.bf16.gmra.mxu3 %vm361_vm7, %v1852_v3 }
  0xe6   :  { %462 = vmatpush.bf16.msrb.mxu2 %v1499_v2  ;;  %v1533_v2 = vld [vmem:[#allocation10 + $0x190] sm:$0xff] }
  0xe7   :  { %850 = vmatpush.bf16.msrb.mxu3 %v1535_v0 }
  0xe9   :  { %463 = vmatmul.bf16.vlgmr.msrb.gmra.mxu2 %v1822_v28 }
  0xea   :  { %762 = vmatpush.bf16.msra.mxu2 %v1530_v4  ;;  %v1532_v4 = vld [vmem:[#allocation10 + $0x188] sm:$0xff] }
  0xeb   :  { %v554_v18 = vpop.f32.mrf.mxu1  ;;  %851 = vmatpush.bf16.msrb.mxu3 %v1534_v1 }
  0xee   :  { %763 = vmatpush.bf16.msra.mxu2 %v1529_v5 }
  0xef   :  { %852 = vmatpush.bf16.msrb.mxu3 %v1533_v2 }
  0xf2   :  { %764 = vmatpush.bf16.msra.mxu2 %v1528_v6  ;;  %v1531_v6 = vld [vmem:[#allocation10 + $0x180] sm:$0xff] }
  0xf3   :  { %v556_v22 = vpop.f32.mrf.mxu1  ;;  %853 = vmatpush.bf16.msrb.mxu3 %v1532_v4 }
  0xf6   :  { %765 = vmatpush.bf16.msra.mxu2 %v1527_v7 }
  0xf7   :  { %854 = vmatpush.bf16.msrb.mxu3 %v1531_v6 }
  0xf9   :  { %468 = vmatmul.bf16.gmra.mxu2 %v1828_v33 }
  0xfa   :  { %766 = vmatpush.bf16.msra.mxu2 %v1526_v9 }
  0xfe   :  { %767 = vmatpush.bf16.msra.mxu2 %v1525_v11 }
 0x102   :  { %768 = vmatpush.bf16.msra.mxu2 %v1524_v14 }
 0x106   :  { %769 = vmatpush.bf16.msra.mxu2 %v1523_v16 }
 0x14c   :  { %v344_v19 = vpop.f32.mrf.mxu2 }
 0x154   :  { %v346_v23 = vpop.f32.mrf.mxu2 }
 0x158   :  { %v381_v25 = vpop.f32.mrf.mxu3 }
 0x159   :  { %v382_v26 = vadd.f32 %v381_v25, %v344_v19 }
 0x15b   :  { %v558_v30 = vadd.f32 %v549_v8, %v382_v26 }
 0x15c   :  { %v349_v28 = vpop.f32.mrf.mxu2 }
 0x15d   :  { %v565_v33 = vadd.f32 %v1565_v31, %v558_v30  ;;  %v1546_v30 = vld [vmem:[#allocation10 + $0x238] sm:$0xff] }
 0x15f   :  { %v682_v37 = vmul.f32 0.01, %v565_v33  ;;  %vm679_vm8 = vcmp.ge.f32.partialorder %v565_v33, 0.0 }
 0x160   :  { %v383_v32 = vpop.f32.mrf.mxu3 }
 0x161   :  { %v384_v34 = vadd.f32 %v383_v32, %v346_v23  ;;  %v685_v41 = vsel %vm679_vm8, %v565_v33, %v682_v37  ;;  %v1544_v32 = vld [vmem:[#allocation10 + $0x228] sm:$0xff]  ;;  %v1543_v33 = vld [vmem:[#allocation10 + $0x220] sm:$0xff] }
 0x163   :  { %v559_v35 = vadd.f32 %v551_v13, %v384_v34  ;;  %v1542_v34 = vld [vmem:[#allocation10 + $0x218] sm:$0xff] }
 0x164   :  { %v351_v36 = vpop.f32.mrf.mxu2 }
 0x165   :  { %v566_v38 = vadd.f32 %v1565_v31, %v559_v35  ;;  %v1541_v35 = vld [vmem:[#allocation10 + $0x210] sm:$0xff]  ;;  %v1539_v36 = vld [vmem:[#allocation10 + $0x200] sm:$0xff] }
 0x167   :  { %vm680_vm9 = vcmp.ge.f32.partialorder %v566_v38, 0.0  ;;  %v683_v39 = vmul.f32 0.01, %v566_v38 }
 0x168   :  { %v386_v40 = vpop.f32.mrf.mxu3 }
 0x169   :  { %v686_v42 = vsel %vm680_vm9, %v566_v38, %v683_v39  ;;  %v387_v43 = vadd.f32 %v386_v40, %v349_v28 }
 0x16a   :  { %v1859_v44 = vpack.c.bf16 %v686_v42, %v685_v41 }
 0x16b   :  { %v560_v45 = vadd.f32 %v554_v18, %v387_v43  ;;  %v644_v18 = vpop.f32.mrf.mxu0 }
 0x16c   :  { %v464_v46 = vpop.f32.mrf.mxu2  ;;  %770 = vmatmul.bf16.vlgmr.msra.gmra.mxu2 %v1859_v44 }
 0x16d   :  { %v567_v29 = vadd.f32 %v1565_v31, %v560_v45  ;;  %v1467_v45 = vld [vmem:[%s1918_s7 + $0x14] sm:$0xf] }
 0x16f   :  { %v684_v50 = vmul.f32 0.01, %v567_v29  ;;  %vm681_vm10 = vcmp.ge.f32.partialorder %v567_v29, 0.0 }
 0x170   :  { %v388_v47 = vpop.f32.mrf.mxu3 }
 0x171   :  { %v687_v51 = vsel %vm681_vm10, %v567_v29, %v684_v50  ;;  %v1098_v29 = vunpack.c.l.b16 %v1467_v45 }
 0x172   :  { %v1862_v52 = vpack.c.bf16 %v687_v51, %v687_v51 }
 0x174   :  { %v466_v49 = vpop.f32.mrf.mxu2 }
 0x175   :  { %v473_v56 = vpack.c.bf16 %v466_v49, %v464_v46  ;;  %v1100_v49 = vpack.c.b16 %v1098_v29, %v1098_v29 }
 0x177   :  { %v1103_v51 = vsel %vm368_vm6, %v1100_v49, 0 }
 0x178   :  { %1549 = vmatpush.bf16.msrb.mxu2 %v1103_v51 }
 0x17c   :  { %v469_v53 = vpop.f32.mrf.mxu2  ;;  %775 = vmatmul.bf16.gmra.mxu2 %v1862_v52 }
 0x17d   :  { %v474_v54 = vpack.c.bf16 %v469_v53, %v469_v53  ;;  %v1547_v53 = vld [vmem:[%s1918_s7] sm:$0xff] }
 0x17f   :  { %v656_v55 = vsel %vm368_vm6, %v474_v54, 0 }
 0x180   :  { %664 = vmatpush.bf16.msra.mxu1 %v656_v55 }
 0x184   :  { %v471_v59 = vpop.f32.mrf.mxu2  ;;  %665 = vmatpush.bf16.msra.mxu1 %v473_v56  ;;  %v1567_v56 = vld [vmem:[#allocation11 + $0x2] ss:$0 sm:$0xff] }
 0x187   :  { %1352 = vmatmul.msk.bf16.vlgmr.msra.gmra.mxu1 %vm361_vm7, %v1482_v57 }
 0x1ef   :  { %v771_v5 = vpop.f32.mrf.mxu2 }
 0x1f7   :  { %v773_v7 = vpop.f32.mrf.mxu2 }
 0x1f8   :  { %v780_v13 = vpack.c.bf16 %v773_v7, %v771_v5  ;;  %v1548_v7 = vld [vmem:[%s1918_s7 + $0xc] sm:$0xff] }
 0x1f9   :  { %1550 = vmatpush.bf16.msrb.mxu2 %v1548_v7 }
 0x1ff   :  { %v776_v8 = vpop.f32.mrf.mxu2 }
 0x200   :  { %v781_v9 = vpack.c.bf16 %v776_v8, %v776_v8 }
 0x202   :  { %v881_v11 = vsel %vm368_vm6, %v781_v9, 0 }
 0x203   :  { %889 = vmatpush.bf16.msra.mxu0 %v881_v11 }
 0x204   :  { %v667_v12 = vpop.f32.mrf.mxu1 }
 0x205   :  { %v668_v14 = vadd.f32 %v667_v12, %v642_v10 }
 0x207   :  { %v778_v16 = vpop.f32.mrf.mxu2  ;;  %890 = vmatpush.bf16.msra.mxu0 %v780_v13  ;;  %v677_v17 = vadd.f32 %v1566_v15, %v668_v14 }
 0x209   :  { %v692_v21 = vmul.f32 0.01, %v677_v17  ;;  %vm690_vm11 = vcmp.ge.f32.partialorder %v677_v17, 0.0 }
 0x20a   :  { %1419 = vmatmul.msk.bf16.vlgmr.msra.gmra.mxu0 %vm361_vm7, %v1844_v58  ;;  %v1545_v58 = vld [vmem:[#allocation10 + $0x230] sm:$0xff] }
 0x20b   :  { %v694_v24 = vsel %vm690_vm11, %v677_v17, %v692_v21  ;;  %1111 = vmatpush.bf16.msrb.mxu0 %v1103_v51 }
 0x20c   :  { %v669_v19 = vpop.f32.mrf.mxu1 }
 0x20d   :  { %v670_v20 = vadd.f32 %v669_v19, %v644_v18 }
 0x20f   :  { %v678_v22 = vadd.f32 %v1566_v15, %v670_v20  ;;  %1112 = vmatpush.bf16.msrb.mxu0 %v1548_v7 }
 0x211   :  { %vm691_vm12 = vcmp.ge.f32.partialorder %v678_v22, 0.0  ;;  %v693_v23 = vmul.f32 0.01, %v678_v22 }
 0x213   :  { %v695_v25 = vsel %vm691_vm12, %v678_v22, %v693_v23 }
 0x214   :  { %v696_v26 = vpack.c.bf16 %v695_v25, %v694_v24 }
 0x216   :  { %855 = vmatmul.bf16.vlgmr.msrb.gmra.mxu3 %v696_v26 }
 0x21a   :  { %1420 = vmatmul.msk.bf16.gmra.mxu0 %vm361_vm7, %v1852_v3  ;;  %v1540_v3 = vld [vmem:[#allocation10 + $0x208] sm:$0xff] }
 0x299   :  { %v856_v27 = vpop.f32.mrf.mxu3 }
 0x2a1   :  { %v858_v28 = vpop.f32.mrf.mxu3 }
 0x2a2   :  { %v861_v31 = vpack.c.bf16 %v858_v28, %v856_v27 }
 0x2a4   :  { %869 = vmatpush.bf16.msrb.mxu1 %v861_v31 }
 0x2a7   :  { %1417 = vmatmul.msk.bf16.vlgmr.msrb.gmra.mxu1 %vm328_vm5, %v1835_v48  ;;  %v892_v48 = vpop.f32.mrf.mxu0 }
 0x2a8   :  { %966 = vmatpush.bf16.msra.mxu1 %v1546_v30 }
 0x2ac   :  { %967 = vmatpush.bf16.msra.mxu1 %v1545_v58 }
 0x2af   :  { %v894_v37 = vpop.f32.mrf.mxu0 }
 0x2b0   :  { %968 = vmatpush.bf16.msra.mxu1 %v1544_v32 }
 0x2b4   :  { %969 = vmatpush.bf16.msra.mxu1 %v1543_v33 }
 0x2b7   :  { %1418 = vmatmul.msk.bf16.gmra.mxu1 %vm328_vm5, %v1846_v61  ;;  %v897_v38 = vpop.f32.mrf.mxu0  ;;  %v999_v61 = vld [vmem:[%s1918_s7 + $0x8] sm:$0xf]  ;;  %s1758_s7 = smov [#allocation13]  }
 0x2b8   :  { %970 = vmatpush.bf16.msra.mxu1 %v1542_v34  ;;  %s1161_s23 = sshll.u32 %s1758_s7, 4  ;;  %s1162_s23 = int_to_ptr.vmem [resolvable:$true] %s1161_s23 }
 0x2bc   :  { %971 = vmatpush.bf16.msra.mxu1 %v1541_v35 }
 0x2bf   :  { %v899_v39 = vpop.f32.mrf.mxu0 }
 0x2c0   :  { %972 = vmatpush.bf16.msra.mxu1 %v1540_v3 }
 0x2c4   :  { %973 = vmatpush.bf16.msra.mxu1 %v1539_v36 }
 0x2c7   :  { %974 = vmatmul.bf16.vlgmr.msra.gmra.mxu1 %v1859_v44  ;;  %v1021_v44 = vunpack.c.l.b16 %v999_v61 }
 0x2c9   :  { %v1023_v47 = vpack.c.b16 %v1021_v44, %v1021_v44 }
 0x2cb   :  { %v1050_v50 = vsel %vm368_vm6, %v1023_v47, 0 }
 0x2cc   :  { %1058 = vmatpush.bf16.msra.mxu3 %v1050_v50 }
 0x2d0   :  { %1059 = vmatpush.bf16.msra.mxu3 %v1547_v53 }
 0x2d7   :  { %979 = vmatmul.bf16.gmra.mxu1 %v1862_v52 }
 0x324   :  { %v871_v40 = vpop.f32.mrf.mxu1 }
 0x325   :  { %v893_v52 = vadd.f32 %v892_v48, %v871_v40 }
 0x32c   :  { %v873_v41 = vpop.f32.mrf.mxu1 }
 0x32d   :  { %v895_v54 = vadd.f32 %v894_v37, %v873_v41 }
 0x334   :  { %v876_v42 = vpop.f32.mrf.mxu1 }
 0x335   :  { %v898_v1 = vadd.f32 %v897_v38, %v876_v42 }
 0x33c   :  { %v878_v43 = vpop.f32.mrf.mxu1 }
 0x344   :  { %v975_v46 = vpop.f32.mrf.mxu1 }
 0x345   :  { %v984_v55 = vadd.f32 %v975_v46, %v893_v52 }
 0x347   :  { %v992_v60 = vadd.f32 %v1567_v56, %v984_v55 }
 0x34c   :  { %v977_v57 = vpop.f32.mrf.mxu1 }
 0x34d   :  { %v985_v59 = vadd.f32 %v977_v57, %v895_v54 }
 0x34f   :  { %v993_v62 = vadd.f32 %v1567_v56, %v985_v59 }
 0x351   :  { %v995_v63 = vpack.c.bf16 %v993_v62, %v992_v60 }
 0x353   :  { %1000 = vxpose.xlu0.c.b16.start [1/2] (short) %v995_v63, 128 }
 0x354   :  { %v980_v0 = vpop.f32.mrf.mxu1 }
 0x355   :  { %v986_v2 = vadd.f32 %v980_v0, %v898_v1 }
 0x357   :  { %v994_v5 = vadd.f32 %v1567_v56, %v986_v2 }
 0x359   :  { %v996_v6 = vpack.c.bf16 %v994_v5, %v994_v5 }
 0x35c   :  { %v982_v4 = vpop.f32.mrf.mxu1 }
 0x363   :  { %1001 = vxpose.xlu0.c.b16.end [2/2] (short) %v996_v6, 128 }
 0x3ff   :  { %v1008_v8 = vpop.trf.xlu0 }
 0x400   :  { %1457 = vmatmul.msk.bf16.vlgmr.msra.gmra.mxu3 %vm361_vm7, %v1008_v8  ;;  %1472 = vmatmul.msk.bf16.vlgmr.msrb.gmra.mxu0 %vm361_vm7, %v1008_v8 }
 0x40f   :  { %v1009_v9 = vpop.trf.xlu0 }
 0x410   :  { %1458 = vmatmul.msk.bf16.gmra.mxu3 %vm361_vm7, %v1009_v9  ;;  %1473 = vmatmul.msk.bf16.gmra.mxu0 %vm361_vm7, %v1009_v9 }
 0x41f   :  { %v1010_v10 = vpop.trf.xlu0 }
 0x420   :  { %1459 = vmatmul.msk.bf16.gmra.mxu3 %vm361_vm7, %v1010_v10  ;;  %1474 = vmatmul.msk.bf16.gmra.mxu0 %vm361_vm7, %v1010_v10 }
 0x42f   :  { %v1011_v11 = vpop.trf.xlu0 }
 0x430   :  { %1460 = vmatmul.msk.bf16.gmra.mxu3 %vm361_vm7, %v1011_v11  ;;  %1475 = vmatmul.msk.bf16.vlgmr.msrb.gmra.mxu2 %vm361_vm7, %v1011_v11 }
 0x43f   :  { %v1012_v12 = vpop.trf.xlu0 }
 0x440   :  { %1461 = vmatmul.msk.bf16.gmra.mxu3 %vm361_vm7, %v1012_v12  ;;  %1476 = vmatmul.msk.bf16.gmra.mxu2 %vm361_vm7, %v1012_v12 }
 0x44f   :  { %v1013_v13 = vpop.trf.xlu0 }
 0x450   :  { %1462 = vmatmul.msk.bf16.gmra.mxu3 %vm361_vm7, %v1013_v13  ;;  %1477 = vmatmul.msk.bf16.gmra.mxu2 %vm361_vm7, %v1013_v13 }
 0x45f   :  { %v1014_v14 = vpop.trf.xlu0 }
 0x460   :  { %1463 = vmatmul.msk.bf16.gmra.mxu3 %vm361_vm7, %v1014_v14  ;;  %1478 = vmatmul.msk.bf16.gmra.mxu2 %vm361_vm7, %v1014_v14 }
 0x46f   :  { %v1015_v15 = vpop.trf.xlu0 }
 0x470   :  { %1464 = vmatmul.msk.bf16.gmra.mxu3 %vm361_vm7, %v1015_v15  ;;  %1479 = vmatmul.msk.bf16.gmra.mxu2 %vm361_vm7, %v1015_v15 }
 0x47d   :  { %v1114_v16 = vpop.f32.mrf.mxu0 }
 0x483   :  { %v1061_v17 = vpop.f32.mrf.mxu3 }
 0x484   :  { %v1142_v24 = vmul.f32 %v1114_v16, %v1061_v17 }
 0x485   :  { %v1116_v18 = vpop.f32.mrf.mxu0 }
 0x48b   :  { %v1063_v19 = vpop.f32.mrf.mxu3 }
 0x48c   :  { %v1143_v23 = vmul.f32 %v1116_v18, %v1063_v19 }
 0x48d   :  { %v1119_v20 = vpop.f32.mrf.mxu0 }
 0x48e   :  { %v1146_v26 = vadd.f32 %v1143_v23, %v1142_v24 }
 0x493   :  { %v1066_v21 = vpop.f32.mrf.mxu3 }
 0x494   :  { %v1144_v25 = vmul.f32 %v1119_v20, %v1066_v21 }
 0x495   :  { %v1121_v22 = vpop.f32.mrf.mxu0 }
 0x496   :  { %v1147_v28 = vadd.f32 %v1146_v26, %v1144_v25 }
 0x49b   :  { %v1068_v27 = vpop.f32.mrf.mxu3 }
 0x49c   :  { %v1145_v30 = vmul.f32 %v1121_v22, %v1068_v27 }
 0x49d   :  { %v1124_v31 = vpop.f32.mrf.mxu0 }
 0x49e   :  { %v1148_v58 = vadd.f32 %v1147_v28, %v1145_v30 }
 0x4a0   :  { %v1149_v32 = vrot.slane %v1148_v58, 4 }
 0x4a2   :  { %v1150_v33 = vadd.f32 %v1149_v32, %v1148_v58 }
 0x4a3   :  { %v1071_v34 = vpop.f32.mrf.mxu3 }
 0x4a4   :  { %v1151_v35 = vrot.slane %v1150_v33, 2 }
 0x4a5   :  { %v1125_v3 = vpop.f32.mrf.mxu0 }
 0x4a6   :  { %v1152_v36 = vadd.f32 %v1151_v35, %v1150_v33 }
 0x4a8   :  { %v1153_v48 = vrot.slane %v1152_v36, 1 }
 0x4aa   :  { %v1154_v37 = vadd.f32 %v1153_v48, %v1152_v36 }
 0x4ab   :  { %v1072_v38 = vpop.f32.mrf.mxu3 }
 0x4ac   :  { %1155 = vst [vmem:[#allocation13] sm:$0x1] %v1154_v37 }
 0x4ad   :  { %1166 = dma.vmem_to_hbm [thread:$0]  %s1162_s23, 16, %s1164_s4, [#allocation4]  }
 0x4b3   :  { %v1074_v39 = vpop.f32.mrf.mxu3  ;;  %v1127_v40 = vpop.f32.mrf.mxu2 }
 0x4bb   :  { %v1075_v41 = vpop.f32.mrf.mxu3  ;;  %v1128_v42 = vpop.f32.mrf.mxu2 }
 0x4c3   :  { %v1077_v43 = vpop.f32.mrf.mxu3  ;;  %v1130_v61 = vpop.f32.mrf.mxu2 }
 0x4cb   :  { %v1078_v45 = vpop.f32.mrf.mxu3  ;;  %v1131_v46 = vpop.f32.mrf.mxu2 }
 0x4d3   :  { %v1080_v44 = vpop.f32.mrf.mxu3  ;;  %v1133_v29 = vpop.f32.mrf.mxu2 }
 0x4db   :  { %v1081_v47 = vpop.f32.mrf.mxu3  ;;  %v1134_v49 = vpop.f32.mrf.mxu2 }
 0x4e3   :  { %v1083_v50 = vpop.f32.mrf.mxu3  ;;  %v1136_v51 = vpop.f32.mrf.mxu2 }
 0x4eb   :  { %v1084_v52 = vpop.f32.mrf.mxu3  ;;  %v1137_v53 = vpop.f32.mrf.mxu2 }
 0x4f3   :  { %v1086_v54 = vpop.f32.mrf.mxu3  ;;  %v1139_v55 = vpop.f32.mrf.mxu2 }
 0x4fb   :  { %v1087_v56 = vpop.f32.mrf.mxu3  ;;  %v1140_v57 = vpop.f32.mrf.mxu2 }
 0x4fc   :  { %1744 = dma.done.wait [#allocation4], 16  }
 0x4fd   :  { %1745 = vsyncadd [#allocation4], 4294967280 }
 0x4fe   :  { %1171 = vsyncpa [#allocation3], 1 }
 0x4ff   :  { %1172 = vsyncpa [#allocation6], 1 }
 0x500   :  { %1173 = vsyncpa [#allocation9], 1 }
 0x501   :  { %1174 = vsyncpa [#allocation12], 1 }
 0x502   :  { %1175 = vsyncpa [#allocation4], 1 }

</bundles_post_ra>
